<compile_context>
chip_gen: v7x
topology: tpu7x:2x2x1
jax: 0.10.0
libtpu: 0.0.40
codegen_flags: <defaults>
</compile_context>

<pallas_src>
import jax
import jax.numpy as jnp
from jax import lax
from jax.experimental import pallas as pl
from jax.experimental.pallas import tpu as pltpu


def _round_up(x, m):
    return ((x + m - 1) // m) * m


def _head_kernel(x_ref, w1_ref, b1_ref, w2_ref, b2_ref, out_ref, acc_ref):
    """One (batch-tile, K-tile) grid step.

    x:   [tb, tk]  CLS-token feature chunk (input dtype)
    w1:  [H,  tk]  dense weight chunk, PyTorch [out, in] layout (bf16)
    b1:  [1,  H]   dense bias (f32)
    w2:  [Lp, H]   out_proj weight, label dim zero-padded to Lp (f32)
    b2:  [1,  Lp]  out_proj bias, zero-padded (f32)
    out: [tb, Lp]
    acc: [tb, H]   f32 VMEM accumulator for the dense matmul
    """
    k = pl.program_id(1)

    @pl.when(k == 0)
    def _():
        acc_ref[...] = jnp.zeros_like(acc_ref)

    # Partial dense matmul: x_chunk @ W1_chunk^T with f32 MXU accumulation.
    x = x_ref[...].astype(w1_ref.dtype)
    acc_ref[...] += lax.dot_general(
        x, w1_ref[...],
        dimension_numbers=(((1,), (1,)), ((), ())),
        preferred_element_type=jnp.float32,
    )

    @pl.when(k == pl.num_programs(1) - 1)
    def _():
        # TODO(synk): dropout is identity in eval mode; training-mode dropout
        # would use pltpu.prng_seed / pltpu.prng_random_bits here.
        h = jnp.tanh(acc_ref[...] + b1_ref[...])        # f32 bias add + tanh
        # out_proj kept fully in f32 (tiny weight; avoids re-quantizing h).
        y = lax.dot_general(
            h, w2_ref[...],
            dimension_numbers=(((1,), (1,)), ((), ())),
            preferred_element_type=jnp.float32,
        )
        out_ref[...] = (y + b2_ref[...]).astype(out_ref.dtype)


def prepare_roberta_head_params(dense_w, dense_b, out_w, out_b,
                                *, weight_dtype=jnp.bfloat16):
    """One-time (load-time) parameter preparation.

    Casts / padding are done here, NOT per forward call.  Weights stay in
    PyTorch [out, in] layout.
    """
    H = dense_w.shape[0]
    L = out_w.shape[0]
    Lp = _round_up(L, 128)                                        # lane-dense stores
    w1 = jnp.asarray(dense_w, dtype=weight_dtype)                 # [H, H]
    b1 = jnp.asarray(dense_b, dtype=jnp.float32).reshape(1, H)    # [1, H]
    w2 = jnp.zeros((Lp, H), jnp.float32).at[:L, :].set(
        jnp.asarray(out_w, dtype=jnp.float32))                    # [Lp, H]
    b2 = jnp.zeros((1, Lp), jnp.float32).at[0, :L].set(
        jnp.asarray(out_b, dtype=jnp.float32))                    # [1, Lp]
    return {"w1": w1, "b1": b1, "w2": w2, "b2": b2, "num_labels": L}


def roberta_classification_head(features, params, *, block_b=512):
    """features: [B, S, H], contiguous row-major, CLS token at seq index 0
    (RoBERTa's <s>).  params: output of prepare_roberta_head_params.
    Returns logits [B, num_labels] in features.dtype.
    """
    B, S, H = features.shape
    w1, b1, w2, b2 = params["w1"], params["b1"], params["w2"], params["b2"]
    L = params["num_labels"]
    Lp = w2.shape[0]
    assert w1.shape == (H, H) and b1.shape == (1, H) and b2.shape == (1, Lp)

    # Batch tiling: >= 2 grid steps for B > 8 (v7x megacore split / pipelining),
    # tb kept a multiple of 8 so partial last tiles stay on the legal path.
    if B <= 8:
        tb = B
    else:
        tb = min(block_b, _round_up(pl.cdiv(B, 2), 8))
    num_b = pl.cdiv(B, tb)

    # K (contraction) tiling of the dense matmul: only an [H, tk] slab of w1
    # is VMEM-resident at a time, and its DMA overlaps MXU work.
    if H >= 1024 and H % 512 == 0:
        tk = 512
    else:
        tk = H
    num_k = H // tk

    # CLS-token selection.  If H is lane-aligned, read it straight out of a
    # free [B, S*H] reshape via the BlockSpec (columns [k*tk, (k+1)*tk) all lie
    # inside the first H columns == token 0) -- no HBM round trip for the
    # slice.  Requires contiguous row-major [B, S, H] with CLS at position 0.
    if H % 128 == 0 or S == 1:
        x_src = features.reshape(B, S * H)
    else:
        x_src = features[:, 0, :]          # XLA slice fallback for unaligned H

    x_spec = pl.BlockSpec((tb, tk), lambda i, k: (i, k))

    # Constant-index parameter blocks are single-buffered: nothing changes
    # across grid steps, so double-buffering would only waste VMEM.
    resident = pl.Buffered(1)
    if num_k == 1:
        w1_spec = pl.BlockSpec((H, tk), lambda i, k: (0, k), pipeline_mode=resident)
    else:
        w1_spec = pl.BlockSpec((H, tk), lambda i, k: (0, k))   # streamed over K
    b1_spec = pl.BlockSpec((1, H), lambda i, k: (0, 0), pipeline_mode=resident)
    w2_spec = pl.BlockSpec((Lp, H), lambda i, k: (0, 0), pipeline_mode=resident)
    b2_spec = pl.BlockSpec((1, Lp), lambda i, k: (0, 0), pipeline_mode=resident)
    out_spec = pl.BlockSpec((tb, Lp), lambda i, k: (i, 0))

    out = pl.pallas_call(
        _head_kernel,
        out_shape=jax.ShapeDtypeStruct((B, Lp), features.dtype),
        grid_spec=pltpu.PrefetchScalarGridSpec(
            num_scalar_prefetch=0,
            grid=(num_b, num_k),
            in_specs=[x_spec, w1_spec, b1_spec, w2_spec, b2_spec],
            out_specs=out_spec,
            scratch_shapes=[pltpu.VMEM((tb, H), jnp.float32)],
        ),
        compiler_params=pltpu.CompilerParams(
            dimension_semantics=("parallel", "arbitrary"),
            vmem_limit_bytes=48 * 1024 * 1024,
        ),
    )(x_src, w1, b1, w2, b2)

    # TODO(synk): for latency-critical small-batch serving, hide the w1 fetch
    # behind upstream compute via a cross-pallas_call VMEM/SEMAPHORE future
    # (P10) or fuse this head into the last encoder-layer kernel.
    return out[:, :L]


if __name__ == "__main__":
    # Small config: batch=2, seq=8, hidden=32, num_labels=4.
    B, S, H, L = 2, 8, 32, 4

    key = jax.random.PRNGKey(0)
    k_feat, k_w1, k_b1, k_w2, k_b2 = jax.random.split(key, 5)

    features = jax.random.normal(k_feat, (B, S, H), dtype=jnp.float32)
    # Synthetic parameters (shapes match nn.Linear in the module __init__).
    dense_w = jax.random.normal(k_w1, (H, H), dtype=jnp.float32) * 0.02
    dense_b = jax.random.normal(k_b1, (H,), dtype=jnp.float32) * 0.02
    out_w = jax.random.normal(k_w2, (L, H), dtype=jnp.float32) * 0.02
    out_b = jax.random.normal(k_b2, (L,), dtype=jnp.float32) * 0.02

    # Load-time prep (cast/pad once), then the forward call.
    params = prepare_roberta_head_params(dense_w, dense_b, out_w, out_b)
    logits = roberta_classification_head(features, params)
    logits = jax.block_until_ready(logits)
    assert logits.shape == (B, L), logits.shape

    x = features[:, 0, :]

    # Strict check vs a reference emulating the kernel's bf16 x / w1 storage
    # with f32 accumulation and a pure-f32 out_proj.
    xb = x.astype(jnp.bfloat16).astype(jnp.float32)
    w1b = dense_w.astype(jnp.bfloat16).astype(jnp.float32)
    h = jnp.tanh(xb @ w1b.T + dense_b)
    ref_emul = h @ out_w.T + out_b
    assert jnp.allclose(logits, ref_emul, atol=1e-3, rtol=1e-2), (
        float(jnp.max(jnp.abs(logits - ref_emul))))

    # Loose check vs the exact f32 PyTorch-module semantics.
    ref_f32 = jnp.tanh(x @ dense_w.T + dense_b) @ out_w.T + out_b
    assert jnp.allclose(logits, ref_f32, atol=2e-2, rtol=2e-2)

    print("KERNEL_OK")
</pallas_src>

<mosaic_0001>
module attributes {stable_mosaic.version = 11 : i64} {
  func.func @_head_kernel(%arg0: i32, %arg1: i32, %arg2: memref<2x32xf32, #tpu.memory_space<vmem>>, %arg3: memref<32x32xbf16, #tpu.memory_space<vmem>>, %arg4: memref<1x32xf32, #tpu.memory_space<vmem>>, %arg5: memref<128x32xf32, #tpu.memory_space<vmem>>, %arg6: memref<1x128xf32, #tpu.memory_space<vmem>>, %arg7: memref<2x128xf32, #tpu.memory_space<vmem>>, %arg8: memref<2x32xf32, #tpu.memory_space<vmem>>) attributes {dimension_semantics = [#tpu.dimension_semantics<parallel>, #tpu.dimension_semantics<arbitrary>], iteration_bounds = array<i64: 1, 1>, scalar_prefetch = 0 : i64, scratch_operands = 1 : i64, tpu.core_type = #tpu.core_type<tc>, window_params = [{transform_indices = @transform_0, window_bounds = array<i64: 2, 32>}, {pipeline_mode = #tpu.pipeline_mode<synchronous>, transform_indices = @transform_1, window_bounds = array<i64: 32, 32>}, {pipeline_mode = #tpu.pipeline_mode<synchronous>, transform_indices = @transform_2, window_bounds = array<i64: 1, 32>}, {pipeline_mode = #tpu.pipeline_mode<synchronous>, transform_indices = @transform_3, window_bounds = array<i64: 128, 32>}, {pipeline_mode = #tpu.pipeline_mode<synchronous>, transform_indices = @transform_4, window_bounds = array<i64: 1, 128>}, {transform_indices = @transform_5, window_bounds = array<i64: 2, 128>}]} {
    %c0_i32 = arith.constant 0 : i32
    %0 = arith.cmpi eq, %arg1, %c0_i32 : i32
    %1 = arith.extui %0 : i1 to i32
    %c0_i32_0 = arith.constant 0 : i32
    %2 = arith.cmpi ne, %1, %c0_i32_0 : i32
    scf.if %2 {
      %cst_10 = arith.constant 0.000000e+00 : f32
      %13 = vector.broadcast %cst_10 : f32 to vector<2x32xf32>
      %c0_11 = arith.constant 0 : index
      %c0_12 = arith.constant 0 : index
      %14 = vector.load %arg8[%c0_11, %c0_12] : memref<2x32xf32, #tpu.memory_space<vmem>>, vector<2x32xf32>
      tpu.vector_store %arg8[%c0_11, %c0_12], %13 {strides = array<i32>} : memref<2x32xf32, #tpu.memory_space<vmem>>, vector<2x32xf32>,
    } else {
    }
    %c0 = arith.constant 0 : index
    %c0_1 = arith.constant 0 : index
    %3 = vector.load %arg2[%c0, %c0_1] : memref<2x32xf32, #tpu.memory_space<vmem>>, vector<2x32xf32>
    %4 = arith.truncf %3 : vector<2x32xf32> to vector<2x32xbf16>
    %c0_2 = arith.constant 0 : index
    %c0_3 = arith.constant 0 : index
    %5 = vector.load %arg8[%c0_2, %c0_3] : memref<2x32xf32, #tpu.memory_space<vmem>>, vector<2x32xf32>
    %c0_4 = arith.constant 0 : index
    %c0_5 = arith.constant 0 : index
    %6 = vector.load %arg3[%c0_4, %c0_5] : memref<32x32xbf16, #tpu.memory_space<vmem>>, vector<32x32xbf16>
    %cst = arith.constant dense<0.000000e+00> : vector<2x32xf32>
    %7 = tpu.matmul %4, %6, %cst {dimension_numbers = #tpu.dot_dimension_numbers<[1], [1], [0], [0], [0, 0, 1, 0], [], []>} : vector<2x32xbf16>, vector<32x32xbf16>, vector<2x32xf32> -> vector<2x32xf32>
    %8 = arith.addf %5, %7 : vector<2x32xf32>
    %c0_6 = arith.constant 0 : index
    %c0_7 = arith.constant 0 : index
    %9 = vector.load %arg8[%c0_6, %c0_7] : memref<2x32xf32, #tpu.memory_space<vmem>>, vector<2x32xf32>
    tpu.vector_store %arg8[%c0_6, %c0_7], %8 {strides = array<i32>} : memref<2x32xf32, #tpu.memory_space<vmem>>, vector<2x32xf32>,
    %c0_i32_8 = arith.constant 0 : i32
    %10 = arith.cmpi eq, %arg1, %c0_i32_8 : i32
    %11 = arith.extui %10 : i1 to i32
    %c0_i32_9 = arith.constant 0 : i32
    %12 = arith.cmpi ne, %11, %c0_i32_9 : i32
    scf.if %12 {
      %c0_10 = arith.constant 0 : index
      %c0_11 = arith.constant 0 : index
      %13 = vector.load %arg8[%c0_10, %c0_11] : memref<2x32xf32, #tpu.memory_space<vmem>>, vector<2x32xf32>
      %c0_12 = arith.constant 0 : index
      %c0_13 = arith.constant 0 : index
      %14 = vector.load %arg4[%c0_12, %c0_13] : memref<1x32xf32, #tpu.memory_space<vmem>>, vector<1x32xf32>
      %15 = vector.broadcast %14 : vector<1x32xf32> to vector<2x32xf32>
      %16 = arith.addf %13, %15 : vector<2x32xf32>
      %17 = math.tanh %16 : vector<2x32xf32>
      %c0_14 = arith.constant 0 : index
      %c0_15 = arith.constant 0 : index
      %18 = vector.load %arg5[%c0_14, %c0_15] : memref<128x32xf32, #tpu.memory_space<vmem>>, vector<128x32xf32>
      %cst_16 = arith.constant dense<0.000000e+00> : vector<2x128xf32>
      %19 = tpu.matmul %17, %18, %cst_16 {dimension_numbers = #tpu.dot_dimension_numbers<[1], [1], [0], [0], [0, 0, 1, 0], [], []>} : vector<2x32xf32>, vector<128x32xf32>, vector<2x128xf32> -> vector<2x128xf32>
      %c0_17 = arith.constant 0 : index
      %c0_18 = arith.constant 0 : index
      %20 = vector.load %arg6[%c0_17, %c0_18] : memref<1x128xf32, #tpu.memory_space<vmem>>, vector<1x128xf32>
      %21 = vector.broadcast %20 : vector<1x128xf32> to vector<2x128xf32>
      %22 = arith.addf %19, %21 : vector<2x128xf32>
      %c0_19 = arith.constant 0 : index
      %c0_20 = arith.constant 0 : index
      %23 = vector.load %arg7[%c0_19, %c0_20] : memref<2x128xf32, #tpu.memory_space<vmem>>, vector<2x128xf32>
      tpu.vector_store %arg7[%c0_19, %c0_20], %22 {strides = array<i32>} : memref<2x128xf32, #tpu.memory_space<vmem>>, vector<2x128xf32>,
    } else {
    }
    return
  }
  func.func @transform_0(%arg0: i32, %arg1: i32) -> (i32, i32) {
    %c0_i32 = arith.constant 0 : i32
    return %arg0, %arg1 : i32, i32
  }
  func.func @transform_1(%arg0: i32, %arg1: i32) -> (i32, i32) {
    %c0_i32 = arith.constant 0 : i32
    %c0_i32_0 = arith.constant 0 : i32
    return %c0_i32, %arg1 : i32, i32
  }
  func.func @transform_2(%arg0: i32, %arg1: i32) -> (i32, i32) {
    %c0_i32 = arith.constant 0 : i32
    %c0_i32_0 = arith.constant 0 : i32
    %c0_i32_1 = arith.constant 0 : i32
    return %c0_i32, %c0_i32_0 : i32, i32
  }
  func.func @transform_3(%arg0: i32, %arg1: i32) -> (i32, i32) {
    %c0_i32 = arith.constant 0 : i32
    %c0_i32_0 = arith.constant 0 : i32
    %c0_i32_1 = arith.constant 0 : i32
    return %c0_i32, %c0_i32_0 : i32, i32
  }
  func.func @transform_4(%arg0: i32, %arg1: i32) -> (i32, i32) {
    %c0_i32 = arith.constant 0 : i32
    %c0_i32_0 = arith.constant 0 : i32
    %c0_i32_1 = arith.constant 0 : i32
    return %c0_i32, %c0_i32_0 : i32, i32
  }
  func.func @transform_5(%arg0: i32, %arg1: i32) -> (i32, i32) {
    %c0_i32 = arith.constant 0 : i32
    %c0_i32_0 = arith.constant 0 : i32
    return %arg0, %c0_i32 : i32, i32
  }
}

</mosaic_0001>

<bundles_post_ra>
// kernel: tpu_custom_call.1
= control target key start
LH: loop header
LB: loop body
LE: loop exit
PB: predicated region body
PF: predicated region fallthrough
CT: control target
= control target key end

     0   :  { %v419_v1 = vmov 0.0   ;;  %vm45_vm0 = vcmask 261120   ;;  %vm420_vm2 = vmmov 0   ;;  %vm26_vm3 = vcmask 254976   ;;  %s556_s0 = inlined_call_operand.vmem [shape: f32[2,32], index: 0, kind: input, shape index: {}]   ;;  %s557_s1 = inlined_call_operand.vmem [shape: bf16[32,32], index: 1, kind: input, shape index: {}]   ;;  %s558_s2 = inlined_call_operand.vmem [shape: f32[1,32], index: 2, kind: input, shape index: {}]   ;;  %s559_s3 = inlined_call_operand.vmem [shape: f32[128,32], index: 3, kind: input, shape index: {}]   ;;  %s560_s4 = inlined_call_operand.vmem [shape: f32[1,128], index: 4, kind: input, shape index: {}]   ;;  %s561_s5 = inlined_call_operand.hbm [shape: f32[2,128], index: 5, kind: output, shape index: {}]  }
   0x1   :  { %v391_v0 = vld [vmem:[%s557_s1] sm:$0xff]   ;;  %312 = vmatprep.subr.bf16.mxu0 %v419_v1  ;;  %vm462_vm1 = vmpackc.low %vm45_vm0, %vm45_vm0  ;;  %316 = vmatprep.mubr.msk.bf16.mxu0 %vm420_vm2, %v419_v1  ;;  %v112_v5 = vld [vmem:[%s559_s3 + $0x8] sm:$0xff]  ;;  %v421_v7 = vmov 0.0|0.0   ;;  %27 = vst.msk [vmem:[#allocation2] sm:$0x3] %vm26_vm3, %v419_v1 }
   0x2   :  { %v50_v2 = vsel %vm45_vm0, %v391_v0, 0  ;;  %v111_v3 = vld [vmem:[%s559_s3] sm:$0xff]  ;;  %v392_v6 = vld [vmem:[%s557_s1 + $0x8] sm:$0xff]   ;;  %355 = vmatprep.subr.bf16.mxu1 %v421_v7  ;;  %352 = vmatprep.mubr.msk.f32.mxu1 %vm420_vm2, %v419_v1 }
   0x3   :  { %313 = vmatpush3.bf16.xpose.msra.mxu0 %v50_v2  ;;  %v356_v8 = vpack.c.bf16 %v112_v5, %v111_v3 }
   0x4   :  { %314 = vmatprep.subr.bf16.mxu0 %v419_v1 }
   0x5   :  { %358 = vmatpush3.bf16.xpose.msk.msra.mxu1 %vm462_vm1, %v356_v8 }
   0x6   :  { %10 = vsyncpa [#allocation4], 0  ;;  %359 = vmatprep.subr.bf16.mxu1 %v421_v7  ;;  %v113_v9 = vld [vmem:[%s559_s3 + $0x10] sm:$0xff]  ;;  %v114_v10 = vld [vmem:[%s559_s3 + $0x18] sm:$0xff]  ;;  %v53_v11 = vsel %vm45_vm0, %v392_v6, 0  ;;  %s422_s6 = smov [#allocation3]  }
   0x7   :  { %v360_v12 = vpack.c.bf16 %v114_v10, %v113_v9  ;;  %v28_v13 = vld [vmem:[%s556_s0] sm:$0x3]  ;;  %v116_v16 = vld [vmem:[%s559_s3 + $0x28] sm:$0xff]  ;;  %v117_v18 = vld [vmem:[%s559_s3 + $0x30] sm:$0xff]  ;;  %s262_s7 = sshll.u32 %s422_s6, 4  ;;  %s263_s7 = int_to_ptr.vmem [resolvable:$true] %s262_s7 }
   0x8   :  { %v29_v14 = vpack.c.bf16 %v28_v13, %v28_v13  ;;  %v115_v15 = vld [vmem:[%s559_s3 + $0x20] sm:$0xff]  ;;  %v118_v19 = vld [vmem:[%s559_s3 + $0x38] sm:$0xff]  ;;  %v120_v22 = vld [vmem:[%s559_s3 + $0x48] sm:$0xff]  ;;  %s395_s8 = scalar_lea.vmem %s263_s7, 32  ;;  %p400_p1 = scmp.lt.s32.totalorder %s263_s7, %s263_s7 }
   0x9   :  { %v364_v17 = vpack.c.bf16 %v116_v16, %v115_v15  ;;  %v368_v20 = vpack.c.bf16 %v118_v19, %v117_v18  ;;  %v119_v21 = vld [vmem:[%s559_s3 + $0x40] sm:$0xff]  ;;  %v121_v24 = vld [vmem:[%s559_s3 + $0x50] sm:$0xff]  ;;  %v122_v25 = vld [vmem:[%s559_s3 + $0x58] sm:$0xff]  ;;  %p396_p0 = scmp.ne.s32.totalorder %s263_s7, %s395_s8  ;;  %p401_p2 = scmp.lt.s32.totalorder %s395_s8, %s395_s8 }
   0xa   :  { %v372_v23 = vpack.c.bf16 %v120_v22, %v119_v21  ;;  %v376_v26 = vpack.c.bf16 %v122_v25, %v121_v24  ;;  %v123_v27 = vld [vmem:[%s559_s3 + $0x60] sm:$0xff]  ;;  %v124_v28 = vld [vmem:[%s559_s3 + $0x68] sm:$0xff]  ;;  %v125_v30 = vld [vmem:[%s559_s3 + $0x70] sm:$0xff] }
   0xb   :  { %315 = vmatpush3.bf16.xpose.msra.mxu0 %v53_v11  ;;  %v380_v29 = vpack.c.bf16 %v124_v28, %v123_v27  ;;  %v126_v31 = vld [vmem:[%s559_s3 + $0x78] sm:$0xff]  ;;  %v30_v33 = vld [vmem:[#allocation2] sm:$0x3]  ;;  %p402_p3 = por %p401_p2, %p400_p1 }
   0xc   :  { %v384_v32 = vpack.c.bf16 %v126_v31, %v125_v30  ;;  %v273_v39 = vld [vmem:[%s558_s2] ss:$0 sm:$0xff] }
   0xd   :  { %362 = vmatpush3.bf16.xpose.msk.msra.mxu1 %vm462_vm1, %v360_v12  ;;  %v274_v43 = vld [vmem:[%s560_s4] ss:$0 sm:$0xff]  ;;  %p403_p4 = pnand %p402_p3, %p396_p0 }
   0xe   :  { %363 = vmatprep.subr.bf16.mxu1 %v421_v7 }
  0x12   :  { %317 = vmatmul.mubr.msk.bf16.vlgmr.msra.gmra.mrb[0].mxu0 %vm45_vm0, %v29_v14 }
  0x15   :  { %366 = vmatpush3.bf16.xpose.msk.msra.mxu1 %vm462_vm1, %v364_v17 }
  0x16   :  { %367 = vmatprep.subr.bf16.mxu1 %v421_v7 }
  0x1d   :  { %370 = vmatpush3.bf16.xpose.msk.msra.mxu1 %vm462_vm1, %v368_v20 }
  0x1e   :  { %371 = vmatprep.subr.bf16.mxu1 %v421_v7 }
  0x25   :  { %374 = vmatpush3.bf16.xpose.msk.msra.mxu1 %vm462_vm1, %v372_v23 }
  0x26   :  { %375 = vmatprep.subr.bf16.mxu1 %v421_v7 }
  0x2d   :  { %378 = vmatpush3.bf16.xpose.msk.msra.mxu1 %vm462_vm1, %v376_v26 }
  0x2e   :  { %379 = vmatprep.subr.bf16.mxu1 %v421_v7 }
  0x35   :  { %382 = vmatpush3.bf16.xpose.msk.msra.mxu1 %vm462_vm1, %v380_v29 }
  0x36   :  { %383 = vmatprep.subr.bf16.mxu1 %v421_v7 }
  0x3d   :  { %386 = vmatpush3.bf16.xpose.msk.msra.mxu1 %vm462_vm1, %v384_v32 }
  0xe5   :  { %v89_v34 = vpop.f32.mrb[0].mxu0 }
  0xe6   :  { %v95_v35 = vadd.f32 %v89_v34, %v30_v33  ;;  %v318_v36 = vpop.f32.mrb[1].mxu0 }
  0xe7   :  { %v92_v37 = vpop.f32.mrb[2].mxu0 }
  0xe8   :  { %97 = vst.msk [vmem:[#allocation2] sm:$0x3] %vm26_vm3, %v95_v35  ;;  %v319_v38 = vpop.f32.mrb[3].mxu0 }
  0xef   :  { %v101_v40 = vld [vmem:[#allocation2] sm:$0x3] }
  0xf0   :  { %v109_v41 = vadd.f32 %v273_v39, %v101_v40 }
  0xf2   :  { %393 = vtanh.f32 %v109_v41 }
  0xfc   :  { %v394_v42 = vpop.eup %393 }
  0xfd   :  { %353 = vmatmul.mubr.msk.f32.vlgmr.msra.gmra.mrb[0].mxu1 %vm45_vm0, %v394_v42 }
 0x1d0   :  { %v251_v44 = vpop.f32.mrb[0].mxu1 }
 0x1d1   :  { %v252_v45 = vadd.f32 %v274_v43, %v251_v44  ;;  %v354_v46 = vpop.f32.mrb[1].mxu1 }
 0x1d3   :  { %255 = vst [vmem:[#allocation3] sm:$0x3] %v252_v45 }
 0x1d4   :  { %406 = shalt.err (!%p403_p4)
}
 0x1d5   :  { %s407_s0 = scalar_lea.hbm %s561_s5, 32 }
 0x1d6   :  { %p408_p5 = scmp.ne.s32.totalorder %s561_s5, %s407_s0  ;;  %p411_p6 = scmp.lt.u32.totalorder %s407_s0, %s561_s5 }
 0x1d8   :  { %p413_p7 = pnand %p411_p6, %p408_p5 }
 0x1da   :  { %416 = shalt.err (!%p413_p7)
}
 0x1db   :  { %265 = dma.vmem_to_hbm [thread:$0]  %s263_s7, 32, %s561_s5, [#allocation4]  }
 0x1dc   :  { %417 = dma.done.wait [#allocation4], 32  }
 0x1dd   :  { %418 = vsyncadd [#allocation4], 4294967264 }
 0x1de   :  { %269 = vsyncpa [#allocation4], 1 }

</bundles_post_ra>
